<compile_context>
chip_gen: v5e
topology: v5e:2x2
jax: 0.10.0
libtpu: 0.0.40
codegen_flags: <defaults>
</compile_context>

<pallas_src>
import functools

import jax
import jax.numpy as jnp
from jax import lax
from jax.experimental import pallas as pl
from jax.experimental.pallas import tpu as pltpu


def _selection_block(lw, r, dtype):
    """Permutation block S[t, dw*lwo + jo] = 1 iff t == jo*r + dw  (lwo = lw//r).

    Multiplying an (rows, lw) lane-chunk of one dh-phase of the reshaped input
    by S gathers all r dw-phases of that chunk, laid out [dw, jo] along lanes.
    """
    lwo = lw // r
    t = lax.broadcasted_iota(jnp.int32, (lw, lw), 0)   # input lane within chunk
    q = lax.broadcasted_iota(jnp.int32, (lw, lw), 1)   # output lane = dw*lwo + jo
    dw = q // lwo
    jo = q % lwo
    return (t == jo * r + dw).astype(dtype)


def _space_squeeze_kernel(x_ref, s_ref, o_ref, *, ratio, w, lw, compute_dtype,
                          precision):
    r = ratio
    lwo = lw // r
    n_chunks = w // lw
    _, c_t, ho, _ = x_ref.shape

    # (lw, lw) permutation block; constant index_map -> fetched once, resident.
    s = s_ref[...]

    for dh in range(r):                      # r short dots instead of one O(r*W) dot
        for q in range(n_chunks):            # bound the contraction at lw lanes
            base = dh * w + q * lw           # static lane offset into the (r*W) lanes
            xc = x_ref[0, :, :, base:base + lw].astype(compute_dtype)
            xc = xc.reshape(c_t * ho, lw)
            y = jnp.dot(xc, s, preferred_element_type=jnp.float32,
                        precision=precision)
            # Cast once (single streaming VPU pass), then slice per dw phase.
            y = y.astype(o_ref.dtype).reshape(c_t, ho, lw)
            for dw in range(r):
                o_ref[0, dh * r + dw, :, :, q * lwo:(q + 1) * lwo] = (
                    y[:, :, dw * lwo:(dw + 1) * lwo])


def _vmem_capacity_bytes():
    try:
        cap = getattr(pltpu.get_tpu_info(), "vmem_capacity_bytes", None)
        if cap:
            return int(cap)
    except Exception:
        pass
    return 64 * 1024 * 1024        # conservative fallback (v7x per-TensorCore VMEM)


def _pick_lane_chunk(w, r):
    """Contraction-bounding lane chunk: a multiple of r that divides W and, for
    large W, is big enough (>= 128*r) that per-phase stores are lane-dense."""
    target = max(256, 128 * r)
    if w <= target:
        return w
    best = 0
    for lw in range(target - target % r, r - 1, -r):
        if w % lw == 0:
            best = lw
            break
    # Fall back to the full width if only degenerate chunks divide W.
    return best if best >= min(128, w) else w


def _pick_c_tile(c, ho, w, r, lw, itemsize, compute_itemsize, budget_bytes):
    """Largest divisor of C whose per-step VMEM footprint fits the budget."""
    rw = r * w

    def footprint(ct):
        blocks = 4 * ct * ho * rw * itemsize                        # in+out, double-buffered
        inter = ct * ho * lw * (compute_itemsize + 4 + itemsize)    # xc, f32 y, cast
        sel = 2 * lw * lw * compute_itemsize                        # selection block
        return blocks + inter + sel

    best = 1
    for ct in range(1, c + 1):
        if c % ct == 0 and footprint(ct) <= budget_bytes:
            best = ct
    # TODO(synk): prime/awkward C collapses to c_t=1; a ragged-tail (pl.cdiv)
    # or Ho-folded tiling would keep blocks large in that case.
    return best, footprint(best)


def space_squeeze(x, ratio):
    b, c, h, w = x.shape
    r = ratio
    assert h % r == 0 and w % r == 0, "H and W must be divisible by ratio"
    ho, wo = h // r, w // r
    rr = r * r

    # Keep the MXU data path in the native dtype when it is a native MXU type.
    if x.dtype == jnp.bfloat16 or x.dtype == jnp.float32:
        compute_dtype = x.dtype
    else:
        # TODO(synk): integer inputs with |value| > 2^24 lose precision through
        # the f32 selection-matmul path; a DMA/shuffle-only path would be needed.
        compute_dtype = jnp.float32
    # Exact f32: force full-precision MXU passes so the 0/1 permutation matmul
    # cannot be silently truncated to a single bf16 pass.
    precision = lax.Precision.HIGHEST if compute_dtype == jnp.float32 else None

    itemsize = jnp.dtype(x.dtype).itemsize
    compute_itemsize = jnp.dtype(compute_dtype).itemsize

    lw = _pick_lane_chunk(w, r)

    vmem_cap = _vmem_capacity_bytes()
    c_t, footprint = _pick_c_tile(c, ho, w, r, lw, itemsize, compute_itemsize,
                                  budget_bytes=int(0.70 * vmem_cap))

    # Keep at least 2 (parallel) grid steps so both v7x TensorCores get work.
    if b * (c // c_t) < 2 and c_t > 1:
        for ct in range(c_t - 1, 0, -1):
            if c % ct == 0:
                c_t = ct
                break
    n_ct = c // c_t

    vmem_limit = max(32 * 1024 * 1024, footprint + (16 << 20))
    vmem_limit = int(min(vmem_limit, int(0.90 * vmem_cap)))

    # Free, contiguous reshape: the dh phase offset becomes a pure lane offset.
    xr = x.reshape(b, c, ho, r * w)
    # Selection block built once in the wrapper; VMEM-resident across the grid.
    s = _selection_block(lw, r, compute_dtype)

    kernel = functools.partial(_space_squeeze_kernel, ratio=r, w=w, lw=lw,
                               compute_dtype=compute_dtype, precision=precision)

    out5 = pl.pallas_call(
        kernel,
        out_shape=jax.ShapeDtypeStruct((b, rr, c, ho, wo), x.dtype),
        grid=(b, n_ct),
        in_specs=[
            pl.BlockSpec((1, c_t, ho, r * w), lambda i, j: (i, j, 0, 0)),
            pl.BlockSpec((lw, lw), lambda i, j: (0, 0)),   # constant -> DMA'd once
        ],
        out_specs=pl.BlockSpec((1, rr, c_t, ho, wo), lambda i, j: (i, 0, j, 0, 0)),
        compiler_params=pltpu.CompilerParams(
            dimension_semantics=("parallel", "parallel"),
            vmem_limit_bytes=vmem_limit,
        ),
        cost_estimate=pl.CostEstimate(
            flops=2 * b * c * h * w * lw,
            transcendentals=0,
            bytes_accessed=2 * b * c * h * w * itemsize
                           + lw * lw * compute_itemsize,
        ),
    )(xr, s)

    # Free reshape: channel index becomes k*C + ci, matching torch.cat(dim=1).
    return out5.reshape(b, rr * c, ho, wo)


def _reference_space_squeeze(x, ratio):
    # Pure-JAX reference reproducing the PyTorch semantics exactly.
    b, c, h, w = x.shape
    r = ratio
    xr = x.reshape(b, c, h // r, r, w // r, r)
    o = jnp.transpose(xr, (0, 3, 5, 1, 2, 4))      # (b, dh, dw, c, ho, wo)
    return o.reshape(b, c * r * r, h // r, w // r)


if __name__ == "__main__":
    key = jax.random.PRNGKey(0)

    # 1) float32, ratio=2, small module-like shape.
    x = jax.random.normal(key, (2, 4, 16, 16), dtype=jnp.float32)
    out = jax.block_until_ready(space_squeeze(x, 2))
    ref = _reference_space_squeeze(x, 2)
    assert out.shape == ref.shape and out.dtype == ref.dtype
    assert jnp.allclose(out, ref, atol=1e-6, rtol=1e-6), "f32 mismatch vs reference"

    # 2) bfloat16, ratio=2, wide W to exercise lane chunking + lane-dense stores
    #    (0/1 selection is exact in bf16, so require exact equality).
    k2 = jax.random.PRNGKey(1)
    xb = jax.random.normal(k2, (1, 2, 8, 512), dtype=jnp.float32).astype(jnp.bfloat16)
    outb = jax.block_until_ready(space_squeeze(xb, 2))
    refb = _reference_space_squeeze(xb, 2)
    assert outb.shape == refb.shape and outb.dtype == refb.dtype
    assert jnp.array_equal(outb, refb), "bf16 mismatch vs reference"

    # 3) bfloat16, ratio=4 (exercises the r*r phase loops and odd channel count).
    k3 = jax.random.PRNGKey(2)
    xc = jax.random.normal(k3, (1, 3, 16, 16), dtype=jnp.float32).astype(jnp.bfloat16)
    outc = jax.block_until_ready(space_squeeze(xc, 4))
    refc = _reference_space_squeeze(xc, 4)
    assert outc.shape == refc.shape and outc.dtype == refc.dtype
    assert jnp.array_equal(outc, refc), "ratio=4 mismatch vs reference"

    print("KERNEL_OK")
</pallas_src>

<mosaic_0001>
module attributes {stable_mosaic.version = 11 : i64} {
  func.func @_space_squeeze_kernel(%arg0: i32, %arg1: i32, %arg2: memref<1x4x8x32xf32, #tpu.memory_space<vmem>>, %arg3: memref<16x16xf32, #tpu.memory_space<vmem>>, %arg4: memref<1x4x4x8x8xf32, #tpu.memory_space<vmem>>) attributes {dimension_semantics = [#tpu.dimension_semantics<parallel>, #tpu.dimension_semantics<parallel>], iteration_bounds = array<i64: 2, 1>, scalar_prefetch = 0 : i64, scratch_operands = 0 : i64, tpu.core_type = #tpu.core_type<tc>, window_params = [{transform_indices = @transform_0, window_bounds = array<i64: 1, 4, 8, 32>}, {pipeline_mode = #tpu.pipeline_mode<synchronous>, transform_indices = @transform_1, window_bounds = array<i64: 16, 16>}, {transform_indices = @transform_2, window_bounds = array<i64: 1, 4, 4, 8, 8>}]} {
    %c0 = arith.constant 0 : index
    %c0_0 = arith.constant 0 : index
    %0 = vector.load %arg3[%c0, %c0_0] : memref<16x16xf32, #tpu.memory_space<vmem>>, vector<16x16xf32>
    %c0_1 = arith.constant 0 : index
    %c0_2 = arith.constant 0 : index
    %c0_3 = arith.constant 0 : index
    %c0_4 = arith.constant 0 : index
    %1 = vector.load %arg2[%c0_1, %c0_2, %c0_3, %c0_4] : memref<1x4x8x32xf32, #tpu.memory_space<vmem>>, vector<1x4x8x16xf32>
    %2 = vector.shape_cast %1 : vector<1x4x8x16xf32> to vector<4x8x16xf32>
    %3 = vector.shape_cast %2 : vector<4x8x16xf32> to vector<32x16xf32>
    %cst = arith.constant dense<0.000000e+00> : vector<32x16xf32>
    %4 = tpu.matmul %3, %0, %cst {dimension_numbers = #tpu.dot_dimension_numbers<[1], [0], [0], [1], [0, 0, 1, 1], [], []>, precision = #tpu.contract_precision<fp32>} : vector<32x16xf32>, vector<16x16xf32>, vector<32x16xf32> -> vector<32x16xf32>
    %5 = vector.shape_cast %4 : vector<32x16xf32> to vector<4x8x16xf32>
    %6 = vector.extract_strided_slice %5 {offsets = [0, 0, 0], sizes = [4, 8, 8], strides = [1, 1, 1]} : vector<4x8x16xf32> to vector<4x8x8xf32>
    %c0_5 = arith.constant 0 : index
    %c0_6 = arith.constant 0 : index
    %c0_7 = arith.constant 0 : index
    %c0_8 = arith.constant 0 : index
    %c0_9 = arith.constant 0 : index
    %7 = vector.load %arg4[%c0_5, %c0_6, %c0_7, %c0_8, %c0_9] : memref<1x4x4x8x8xf32, #tpu.memory_space<vmem>>, vector<1x1x4x8x8xf32>
    %8 = vector.shape_cast %7 : vector<1x1x4x8x8xf32> to vector<4x8x8xf32>
    %9 = vector.shape_cast %6 : vector<4x8x8xf32> to vector<1x1x4x8x8xf32>
    tpu.vector_store %arg4[%c0_5, %c0_6, %c0_7, %c0_8, %c0_9], %9 {strides = array<i32>} : memref<1x4x4x8x8xf32, #tpu.memory_space<vmem>>, vector<1x1x4x8x8xf32>,
    %10 = vector.extract_strided_slice %5 {offsets = [0, 0, 8], sizes = [4, 8, 8], strides = [1, 1, 1]} : vector<4x8x16xf32> to vector<4x8x8xf32>
    %c0_10 = arith.constant 0 : index
    %c1 = arith.constant 1 : index
    %c0_11 = arith.constant 0 : index
    %c0_12 = arith.constant 0 : index
    %c0_13 = arith.constant 0 : index
    %11 = vector.load %arg4[%c0_10, %c1, %c0_11, %c0_12, %c0_13] : memref<1x4x4x8x8xf32, #tpu.memory_space<vmem>>, vector<1x1x4x8x8xf32>
    %12 = vector.shape_cast %11 : vector<1x1x4x8x8xf32> to vector<4x8x8xf32>
    %13 = vector.shape_cast %10 : vector<4x8x8xf32> to vector<1x1x4x8x8xf32>
    tpu.vector_store %arg4[%c0_10, %c1, %c0_11, %c0_12, %c0_13], %13 {strides = array<i32>} : memref<1x4x4x8x8xf32, #tpu.memory_space<vmem>>, vector<1x1x4x8x8xf32>,
    %c0_14 = arith.constant 0 : index
    %c0_15 = arith.constant 0 : index
    %c0_16 = arith.constant 0 : index
    %c16 = arith.constant 16 : index
    %14 = vector.load %arg2[%c0_14, %c0_15, %c0_16, %c16] : memref<1x4x8x32xf32, #tpu.memory_space<vmem>>, vector<1x4x8x16xf32>
    %15 = vector.shape_cast %14 : vector<1x4x8x16xf32> to vector<4x8x16xf32>
    %16 = vector.shape_cast %15 : vector<4x8x16xf32> to vector<32x16xf32>
    %cst_17 = arith.constant dense<0.000000e+00> : vector<32x16xf32>
    %17 = tpu.matmul %16, %0, %cst_17 {dimension_numbers = #tpu.dot_dimension_numbers<[1], [0], [0], [1], [0, 0, 1, 1], [], []>, precision = #tpu.contract_precision<fp32>} : vector<32x16xf32>, vector<16x16xf32>, vector<32x16xf32> -> vector<32x16xf32>
    %18 = vector.shape_cast %17 : vector<32x16xf32> to vector<4x8x16xf32>
    %19 = vector.extract_strided_slice %18 {offsets = [0, 0, 0], sizes = [4, 8, 8], strides = [1, 1, 1]} : vector<4x8x16xf32> to vector<4x8x8xf32>
    %c0_18 = arith.constant 0 : index
    %c2 = arith.constant 2 : index
    %c0_19 = arith.constant 0 : index
    %c0_20 = arith.constant 0 : index
    %c0_21 = arith.constant 0 : index
    %20 = vector.load %arg4[%c0_18, %c2, %c0_19, %c0_20, %c0_21] : memref<1x4x4x8x8xf32, #tpu.memory_space<vmem>>, vector<1x1x4x8x8xf32>
    %21 = vector.shape_cast %20 : vector<1x1x4x8x8xf32> to vector<4x8x8xf32>
    %22 = vector.shape_cast %19 : vector<4x8x8xf32> to vector<1x1x4x8x8xf32>
    tpu.vector_store %arg4[%c0_18, %c2, %c0_19, %c0_20, %c0_21], %22 {strides = array<i32>} : memref<1x4x4x8x8xf32, #tpu.memory_space<vmem>>, vector<1x1x4x8x8xf32>,
    %23 = vector.extract_strided_slice %18 {offsets = [0, 0, 8], sizes = [4, 8, 8], strides = [1, 1, 1]} : vector<4x8x16xf32> to vector<4x8x8xf32>
    %c0_22 = arith.constant 0 : index
    %c3 = arith.constant 3 : index
    %c0_23 = arith.constant 0 : index
    %c0_24 = arith.constant 0 : index
    %c0_25 = arith.constant 0 : index
    %24 = vector.load %arg4[%c0_22, %c3, %c0_23, %c0_24, %c0_25] : memref<1x4x4x8x8xf32, #tpu.memory_space<vmem>>, vector<1x1x4x8x8xf32>
    %25 = vector.shape_cast %24 : vector<1x1x4x8x8xf32> to vector<4x8x8xf32>
    %26 = vector.shape_cast %23 : vector<4x8x8xf32> to vector<1x1x4x8x8xf32>
    tpu.vector_store %arg4[%c0_22, %c3, %c0_23, %c0_24, %c0_25], %26 {strides = array<i32>} : memref<1x4x4x8x8xf32, #tpu.memory_space<vmem>>, vector<1x1x4x8x8xf32>,
    return
  }
  func.func @transform_0(%arg0: i32, %arg1: i32) -> (i32, i32, i32, i32) {
    %c0_i32 = arith.constant 0 : i32
    %c0_i32_0 = arith.constant 0 : i32
    %c0_i32_1 = arith.constant 0 : i32
    return %arg0, %arg1, %c0_i32, %c0_i32_0 : i32, i32, i32, i32
  }
  func.func @transform_1(%arg0: i32, %arg1: i32) -> (i32, i32) {
    %c0_i32 = arith.constant 0 : i32
    %c0_i32_0 = arith.constant 0 : i32
    %c0_i32_1 = arith.constant 0 : i32
    return %c0_i32, %c0_i32_0 : i32, i32
  }
  func.func @transform_2(%arg0: i32, %arg1: i32) -> (i32, i32, i32, i32, i32) {
    %c0_i32 = arith.constant 0 : i32
    %c0_i32_0 = arith.constant 0 : i32
    %c0_i32_1 = arith.constant 0 : i32
    %c0_i32_2 = arith.constant 0 : i32
    return %arg0, %c0_i32, %arg1, %c0_i32_0, %c0_i32_1 : i32, i32, i32, i32, i32
  }
}

</mosaic_0001>

<bundles_post_ra>
// kernel: tpu_custom_call.1
= control target key start
LH: loop header
LB: loop body
LE: loop exit
PB: predicated region body
PF: predicated region fallthrough
CT: control target
= control target key end

     0   :  { %7 = vsyncpa [#allocation3], 0  ;;  %s1418_s0 = inlined_call_operand.hbm [shape: f32[2,4,8,32], index: 0, kind: input, shape index: {}]   ;;  %s1419_s1 = inlined_call_operand.hbm [shape: f32[16,16], index: 1, kind: input, shape index: {}]   ;;  %s1420_s2 = inlined_call_operand.hbm [shape: f32[2,4,4,8,8], index: 2, kind: output, shape index: {}]  }
   0x1   :  { %9 = vsyncpa [#allocation3 + $0x1], 0 }
   0x2   :  { %10 = vsyncpa [#allocation6], 0 }
   0x3   :  { %11 = vsyncpa [#allocation4], 0 }
   0x4   :  { %13 = vsyncpa [#allocation4 + $0x1], 0  ;;  %s1195_s9 = smov 0   ;;  %s1197_s10 = smov 0  }
   0x5   :  { %s1199_s11 = smov 0   ;;  %s1201_s12 = smov 0  }
   0x6   :  { %s1203_s13 = smov 0   ;;  %s1205_s14 = smov 0  }
   0x7 LB: > { %s915_s15 = sadd.s32 4294967295, %s1171_s14   ;;  %s916_s16 = sadd.s32 4294967294, %s1171_s14   ;;  %s1171_s14 = sphi %s1205_s14, %s19_s14   ;;  %s1167_s13 = sphi %s1203_s13, %s1432_s13   ;;  %s1163_s12 = sphi %s1201_s12, %s1431_s12   ;;  %s1159_s11 = sphi %s1199_s11, %s1430_s11   ;;  %s1155_s10 = sphi %s1197_s10, %s1429_s10   ;;  %s1151_s9 = sphi %s1195_s9, %s1428_s9  }
   0x8   : > { %p53_p0 = scmp.ne.s32.totalorder %s1155_s10, %s1151_s9  ;;  %p1229_p1 = scmp.eq.s32.totalorder %s915_s15, 0 }
   0x9   : > { %p1233_p2 = scmp.eq.s32.totalorder %s915_s15, 1  ;;  %p106_p3 = scmp.eq.s32.totalorder %s916_s16, 1 }
   0xa   : > { %p1239_p4 = por %p1229_p1, %p53_p0  ;;  %p917_p5 = scmp.ge.s32.totalorder %s1171_s14, 1 }
   0xb   : > { %p1244_p6 = por %p106_p3, %p53_p0  ;;  %p113_p7 = scmp.lt.s32.totalorder %s1171_s14, 3 }
   0xc   : > { %s124_s23 = sshll.u32 %s1419_s1, 4  ;;  %s1173_s25 = smov [#allocation5]   ;;  %s125_s23 = int_to_ptr.hbm [resolvable:$true] %s124_s23 }
   0xd   : > { %p1252_p8 = pnand %p917_p5, %p113_p7  ;;  %s126_s26 = sshll.u32 %s1173_s25, 4  ;;  %s127_s26 = int_to_ptr.vmem [resolvable:$true] %s126_s26 }
   0xe   : > { %p919_p11 = scmp.ge.s32.totalorder %s1171_s14, 2  ;;  %s1174_s27 = smov 128  }
   0xf   : > { %p954_p9 = pneg %p1252_p8  ;;  %s1175_s28 = smov 8  }
  0x10   : > { %s31_s29 = sadd.s32 1, %s1167_s13  ;;  %s40_s30 = sadd.s32 1, %s1159_s11 }
  0x11   : > { %p955_p10 = pnand %p954_p9, %p1229_p1  ;;  %p33_p12 = scmp.ge.s32.totalorder %s31_s29, 2 }
  0x12   : > { %p47_p13 = scmp.ne.s32.totalorder %s1159_s11, %s1155_s10  ;;  %p48_p0 = scmp.eq.s32.totalorder %s1171_s14, 0 }
  0x13   : > { %957 = dma.hbm_to_vmem [thread:$0]  (!%p955_p10), %s125_s23, 256, %s127_s26, [#allocation6], %s1174_s27, %s1174_s27, %s1175_s28  }
  0x14   : > { %s1434_s29 = smov (%p33_p12, %s31_s29), 0  ;;  %p1271_p3 = por %p48_p0, %p47_p13 }
  0x15   : > { %p1277_p5 = por %p1233_p2, %p47_p13  ;;  %s35_s5 = ssub.s32 %s1167_s13, %s1434_s29 }
  0x16   : > { %p967_p7 = scmp.lt.s32.totalorder %s1171_s14, 2  ;;  %p38_p9 = scmp.eq.s32.totalorder %s35_s5, 0 }
  0x17   : > { %s140_s6 = sand.u32 1, %s1159_s11   ;;  %s944_s15 = sshll.u32 %s1167_s13, 5 }
  0x18   : > { %s920_s7 = sshll.u32 %s140_s6, 5  ;;  %s151_s22 = scalar_lea.hbm %s1418_s0, %s944_s15 }
  0x19   : > { %s1286_s8 = scalar_select %p38_p9, %s1159_s11, %s40_s30  }
  0x1a   : > { %s144_s23 = scalar_lea.vmem [#allocation2], %s920_s7  ;;  %s152_s18 = sshll.u32 %s151_s22, 4  ;;  %s153_s18 = int_to_ptr.hbm [resolvable:$true] %s152_s18 }
  0x1b   : > { %s154_s25 = sshll.u32 %s144_s23, 4  ;;  %p959_p2 = pnand %p967_p7, %p1271_p3  ;;  %s155_s25 = int_to_ptr.vmem [resolvable:$true] %s154_s25 }
  0x1c   : > { %s141_s26 = scalar_lea.sflag [#allocation3], %s140_s6  ;;  %166 = sbr.rel (%p1252_p8) target bundleno = 466 (0x1d2), region = 28 }
  0x1d   : > { %961 = dma.hbm_to_vmem [thread:$0]  (!%p959_p2), %s153_s18, 512, %s155_s25, %s141_s26, %s1174_s27, %s1174_s27, %s1175_s28  }
  0x1e   : > { %s1300_s30 = sand.u32 (!%p1252_p8), 1, %s1155_s10  }
  0x1f   : > { %s924_s5 = sshll.u32 (!%p1252_p8), %s1300_s30, 5  ;;  %s169_s7 = scalar_lea.sflag (!%p1252_p8), [#allocation3], %s1300_s30 }
  0x20   : > { %s172_s15 = scalar_lea.vmem (!%p1252_p8), [#allocation2], %s924_s5 }
  0x21   : > { %1138 = dma.done.wait (%p1239_p4), %s169_s7, 512  }
  0x22   : > { %1140 = vsyncadd (%p1239_p4), %s169_s7, 4294966784 }
  0x23   : > { %1142 = dma.done.wait (%p1229_p1), [#allocation6], 256  }
  0x24   : > { %1144 = vsyncadd (%p1229_p1), [#allocation6], 4294967040  ;;  %vm207_vm0 = vcmask 130048   ;;  %v498_v0 = vld [vmem:[%s172_s15] sm:$0xff]  ;;  %v499_v1 = vld [vmem:[%s172_s15 + $0x8] sm:$0xff]  ;;  %s1176_s24 = smov 112  }
  0x25   : > { %v500_v2 = vld [vmem:[%s172_s15 + $0x10] sm:$0xff]  ;;  %506 = vrot.lane.b32.xlu0 %v498_v0, %s1176_s24  ;;  %v202_v3 = vld [vmem:[#allocation5 + $0x8] sm:$0xff]  ;;  %v201_v4 = vld [vmem:[#allocation5] sm:$0xff]  ;;  %v209_v5 = vsel %vm207_vm0, %v498_v0, 0  ;;  %v212_v6 = vsel %vm207_vm0, %v499_v1, 0  ;;  %s926_s17 = sshll.u32 %s1300_s30, 7 }
  0x26   : > { %510 = vrot.lane.b32.xlu1 %v500_v2, %s1176_s24  ;;  %v234_v7 = vand.u32 4294901760, %v202_v3  ;;  %v236_v8 = vand.u32 4294901760, %v201_v4  ;;  %v1316_v9 = vand.u32 4294901760, %v209_v5  ;;  %v1318_v10 = vand.u32 4294901760, %v212_v6  ;;  %v501_v16 = vld [vmem:[%s172_s15 + $0x18] sm:$0xff]  ;;  %s1177_s19 = smov 120  }
  0x27   : > { %v215_v11 = vsel %vm207_vm0, %v500_v2, 0  ;;  %v218_v30 = vsel %vm207_vm0, %v501_v16, 0  ;;  %vm472_vm1 = vcmask 64512   ;;  %s1338_s27 = scalar_lea.vmem [#allocation7], %s926_s17  ;;  %s945_s28 = sshll.u32 %s1163_s12, 7 }
  0x28   : > { %235 = vmatpush.msra.mxu0 %v234_v7  ;;  %v286_v12 = vsub.f32 %v202_v3, %v234_v7  ;;  %v239_v13 = vsub.f32 %v209_v5, %v1316_v9  ;;  %v292_v14 = vsub.f32 %v201_v4, %v236_v8  ;;  %v247_v15 = vsub.f32 %v212_v6, %v1318_v10  ;;  %s814_s16 = scalar_lea.hbm %s1420_s2, %s945_s28  ;;  %s815_s21 = sshll.u32 %s1338_s27, 4  ;;  %s816_s21 = int_to_ptr.vmem [resolvable:$true] %s815_s21 }
  0x29   : > { %370 = vmatpush.msra.mxu3 %v234_v7  ;;  %v254_v20 = vand.u32 4294901760, %v215_v11  ;;  %v262_v33 = vand.u32 4294901760, %v218_v30  ;;  %s817_s22 = sshll.u32 %s814_s16, 4  ;;  %s801_s23 = scalar_lea.sflag [#allocation4], %s1300_s30  ;;  %s818_s22 = int_to_ptr.hbm [resolvable:$true] %s817_s22 }
  0x2a   : > { %237 = vmatpush.msra.mxu0 %v236_v8  ;;  %v287_v17 = vand.u32 4294901760, %v286_v12  ;;  %v240_v18 = vand.u32 4294901760, %v239_v13  ;;  %v293_v19 = vand.u32 4294901760, %v292_v14  ;;  %330 = vmatpush.msra.mxu2 %v286_v12  ;;  %v248_v24 = vand.u32 4294901760, %v247_v15  ;;  %s1099_s25 = sshra.s32 %s818_s22, 4  ;;  %s1105_s5 = scalar_lea.hbm %s1420_s2, 256  ;;  %s1100_s25 = int_to_ptr.hbm [resolvable:$true] %s1099_s25 }
  0x2b   : > { %372 = vmatpush.msra.mxu3 %v236_v8  ;;  %v255_v29 = vsub.f32 %v215_v11, %v254_v20  ;;  %v263_v35 = vsub.f32 %v218_v30, %v262_v33  ;;  %s1101_s18 = scalar_lea.hbm %s1100_s25, 128  ;;  %p1106_p10 = scmp.lt.s32.totalorder %s1100_s25, %s1420_s2 }
  0x2c   : > { %v288_v21 = vsub.f32 %v286_v12, %v287_v17  ;;  %v241_v22 = vsub.f32 %v239_v13, %v240_v18  ;;  %v294_v23 = vsub.f32 %v292_v14, %v293_v19  ;;  %415 = vmatpush.msrb.mxu0 %v287_v17  ;;  %376 = vmatmul.f32.vlgmr.msra.gmra.mxu3 %v240_v18  ;;  %p1102_p1 = scmp.ne.s32.totalorder %s1100_s25, %s1101_s18  ;;  %p1107_p12 = scmp.lt.s32.totalorder %s1105_s5, %s1101_s18 }
  0x2d   : > { %508 = vrot.lane.b32.xlu0 %v499_v1, %s1176_s24  ;;  %333 = vmatpush.msra.mxu2 %v292_v14  ;;  %v249_v28 = vsub.f32 %v247_v15, %v248_v24  ;;  %v256_v32 = vand.u32 4294901760, %v255_v29  ;;  %v264_v37 = vand.u32 4294901760, %v263_v35 }
  0x2e   : > { %512 = vrot.lane.b32.xlu1 %v501_v16, %s1176_s24  ;;  %v289_v25 = vand.u32 4294901760, %v288_v21  ;;  %v242_v26 = vand.u32 4294901760, %v241_v22  ;;  %v295_v27 = vand.u32 4294901760, %v294_v23  ;;  %419 = vmatpush.msrb.mxu0 %v293_v19  ;;  %p1103_p4 = pnand %p1102_p1, %p1277_p5  ;;  %p1108_p13 = por %p1107_p12, %p1106_p10 }
  0x2f   : > { %336 = vmatmul.f32.vlgmr.msra.gmra.mxu2 %v239_v13  ;;  %v250_v31 = vand.u32 4294901760, %v249_v28  ;;  %v257_v34 = vsub.f32 %v255_v29, %v256_v32  ;;  %v265_v38 = vsub.f32 %v263_v35, %v264_v37 }
  0x30   : > { %290 = vmatpush.msra.mxu1 %v289_v25  ;;  %243 = vmatmul.f32.vlgmr.msra.gmra.mxu0 %v242_v26  ;;  %p1104_p8 = pneg %p1103_p4 }
  0x31   : > { %592 = vmatpush.msrb.mxu3 %v289_v25  ;;  %537 = vmatpush.msrb.mxu2 %v234_v7  ;;  %v258_v36 = vand.u32 4294901760, %v257_v34  ;;  %v266_v39 = vand.u32 4294901760, %v265_v38 }
  0x32   : > { %296 = vmatpush.msra.mxu1 %v295_v27  ;;  %632 = vmatpush.msra.mxu0 %v286_v12  ;;  %p1109_p0 = pnand %p1108_p13, %p1104_p8 }
  0x33   : > { %298 = vmatmul.f32.vlgmr.msra.gmra.mxu1 %v1316_v9  ;;  %598 = vmatpush.msrb.mxu3 %v295_v27 }
  0x34   : > { %452 = vmatpush.msrb.mxu1 %v234_v7  ;;  %539 = vmatpush.msrb.mxu2 %v236_v8 }
  0x35   : > { %382 = vmatmul.f32.gmra.mxu3 %v248_v24  ;;  %635 = vmatpush.msra.mxu0 %v292_v14 }
  0x36   : > { %717 = vmatpush.msra.mxu2 %v287_v17  ;;  %454 = vmatpush.msrb.mxu1 %v236_v8 }
  0x37   : > { %754 = vmatpush.msra.mxu3 %v234_v7  ;;  %341 = vmatmul.f32.gmra.mxu2 %v247_v15 }
  0x38   : > { %672 = vmatpush.msra.mxu1 %v234_v7  ;;  %251 = vmatmul.f32.gmra.mxu0 %v250_v31 }
  0x39   : > { %721 = vmatpush.msra.mxu2 %v293_v19  ;;  %756 = vmatpush.msra.mxu3 %v236_v8 }
  0x3a   : > { %674 = vmatpush.msra.mxu1 %v236_v8 }
  0x3b   : > { %302 = vmatmul.f32.gmra.mxu1 %v1318_v10 }
  0x3d   : > { %388 = vmatmul.f32.gmra.mxu3 %v256_v32 }
  0x3f   : > { %346 = vmatmul.f32.gmra.mxu2 %v255_v29 }
  0x40   : > { %259 = vmatmul.f32.gmra.mxu0 %v258_v36 }
  0x43   : > { %306 = vmatmul.f32.gmra.mxu1 %v254_v20 }
  0x45   : > { %394 = vmatmul.f32.gmra.mxu3 %v264_v37 }
  0x47   : > { %351 = vmatmul.f32.gmra.mxu2 %v263_v35 }
  0x48   : > { %267 = vmatmul.f32.gmra.mxu0 %v266_v39 }
  0x4b   : > { %310 = vmatmul.f32.gmra.mxu1 %v262_v33 }
  0x50   : > { %421 = vmatmul.f32.vlgmr.msrb.gmra.mxu0 %v1316_v9 }
  0x53   : > { %456 = vmatmul.f32.vlgmr.msrb.gmra.mxu1 %v1316_v9 }
  0x58   : > { %425 = vmatmul.f32.gmra.mxu0 %v1318_v10 }
  0x5b   : > { %460 = vmatmul.f32.gmra.mxu1 %v1318_v10 }
  0x60   : > { %429 = vmatmul.f32.gmra.mxu0 %v254_v20 }
  0x63   : > { %464 = vmatmul.f32.gmra.mxu1 %v254_v20 }
  0x68   : > { %433 = vmatmul.f32.gmra.mxu0 %v262_v33 }
  0x6b   : > { %468 = vmatmul.f32.gmra.mxu1 %v262_v33 }
  0x97   : > { %v507_v40 = vpop.permute.xlu0 %506 }
  0x98   : > { %v514_v41 = vsel %vm207_vm0, %v507_v40, 0  ;;  %v511_v43 = vpop.permute.xlu1 %510 }
  0x99   : > { %v540_v42 = vand.u32 4294901760, %v514_v41  ;;  %v518_v46 = vsel %vm207_vm0, %v511_v43, 0 }
  0x9a   : > { %v556_v51 = vand.u32 4294901760, %v518_v46 }
  0x9b   : > { %v541_v44 = vsub.f32 %v514_v41, %v540_v42  ;;  %600 = vmatmul.f32.vlgmr.msrb.gmra.mxu3 %v540_v42 }
  0x9c   : > { %v557_v55 = vsub.f32 %v518_v46, %v556_v51 }
  0x9d   : > { %v542_v45 = vand.u32 4294901760, %v541_v44  ;;  %638 = vmatmul.f32.vlgmr.msra.gmra.mxu0 %v541_v44 }
  0x9e   : > { %v558_v61 = vand.u32 4294901760, %v557_v55 }
  0x9f   : > { %v509_v47 = vpop.permute.xlu0 %508  ;;  %678 = vmatmul.f32.vlgmr.msra.gmra.mxu1 %v542_v45  ;;  %v543_v48 = vsub.f32 %v541_v44, %v542_v45 }
  0xa0   : > { %v516_v49 = vsel %vm207_vm0, %v509_v47, 0  ;;  %v513_v54 = vpop.permute.xlu1 %512  ;;  %v559_v63 = vsub.f32 %v557_v55, %v558_v61 }
  0xa1   : > { %v548_v50 = vand.u32 4294901760, %v516_v49  ;;  %v544_v52 = vand.u32 4294901760, %v543_v48  ;;  %v520_v57 = vsel %vm207_vm0, %v513_v54, 0 }
  0xa2   : > { %v564_v59 = vand.u32 4294901760, %v520_v57  ;;  %v560_v0 = vand.u32 4294901760, %v559_v63 }
  0xa3   : > { %v549_v53 = vsub.f32 %v516_v49, %v548_v50  ;;  %545 = vmatmul.f32.vlgmr.msrb.gmra.mxu2 %v544_v52  ;;  %604 = vmatmul.f32.gmra.mxu3 %v548_v50 }
  0xa4   : > { %v565_v62 = vsub.f32 %v520_v57, %v564_v59 }
  0xa5   : > { %643 = vmatmul.f32.gmra.mxu0 %v549_v53  ;;  %v550_v56 = vand.u32 4294901760, %v549_v53 }
  0xa6   : > { %v566_v1 = vand.u32 4294901760, %v565_v62 }
  0xa7   : > { %684 = vmatmul.f32.gmra.mxu1 %v550_v56  ;;  %v551_v58 = vsub.f32 %v549_v53, %v550_v56 }
  0xa8   : > { %v567_v3 = vsub.f32 %v565_v62, %v566_v1 }
  0xa9   : > { %v552_v60 = vand.u32 4294901760, %v551_v58 }
  0xaa   : > { %v568_v4 = vand.u32 4294901760, %v567_v3 }
  0xab   : > { %553 = vmatmul.f32.gmra.mxu2 %v552_v60  ;;  %608 = vmatmul.f32.gmra.mxu3 %v556_v51 }
  0xad   : > { %648 = vmatmul.f32.gmra.mxu0 %v557_v55  ;;  %v244_v2 = vpop.f32.mrf.mxu0 }
  0xaf   : > { %690 = vmatmul.f32.gmra.mxu1 %v558_v61  ;;  %v377_v14 = vpop.f32.mrf.mxu3 }
  0xb0   : > { %v299_v5 = vpop.f32.mrf.mxu1 }
  0xb1   : > { %v300_v12 = vadd.f32 %v299_v5, %v244_v2 }
  0xb2   : > { %v337_v9 = vpop.f32.mrf.mxu2 }
  0xb3   : > { %561 = vmatmul.f32.gmra.mxu2 %v560_v0  ;;  %612 = vmatmul.f32.gmra.mxu3 %v564_v59  ;;  %v338_v13 = vadd.f32 %v337_v9, %v300_v12 }
  0xb5   : > { %653 = vmatmul.f32.gmra.mxu0 %v565_v62  ;;  %v252_v6 = vpop.f32.mrf.mxu0  ;;  %v378_v17 = vadd.f32 %v377_v14, %v338_v13 }
  0xb7   : > { %696 = vmatmul.f32.gmra.mxu1 %v566_v1 }
  0xb8   : > { %v303_v7 = vpop.f32.mrf.mxu1  ;;  %v383_v23 = vpop.f32.mrf.mxu3 }
  0xb9   : > { %v304_v16 = vadd.f32 %v303_v7, %v252_v6 }
  0xba   : > { %v342_v19 = vpop.f32.mrf.mxu2 }
  0xbb   : > { %569 = vmatmul.f32.gmra.mxu2 %v568_v4  ;;  %758 = vmatmul.f32.vlgmr.msra.gmra.mxu3 %v540_v42  ;;  %v343_v20 = vadd.f32 %v342_v19, %v304_v16 }
  0xbd   : > { %v260_v8 = vpop.f32.mrf.mxu0  ;;  %v384_v24 = vadd.f32 %v383_v23, %v343_v20 }
  0xc0   : > { %v307_v10 = vpop.f32.mrf.mxu1  ;;  %v389_v33 = vpop.f32.mrf.mxu3 }
  0xc1   : > { %v308_v30 = vadd.f32 %v307_v10, %v260_v8 }
  0xc2   : > { %v347_v31 = vpop.f32.mrf.mxu2 }
  0xc3   : > { %723 = vmatmul.f32.vlgmr.msra.gmra.mxu2 %v540_v42  ;;  %762 = vmatmul.f32.gmra.mxu3 %v548_v50  ;;  %v348_v32 = vadd.f32 %v347_v31, %v308_v30 }
  0xc5   : > { %v268_v11 = vpop.f32.mrf.mxu0  ;;  %v390_v34 = vadd.f32 %v389_v33, %v348_v32 }
  0xc8   : > { %v311_v15 = vpop.f32.mrf.mxu1  ;;  %v395_v42 = vpop.f32.mrf.mxu3 }
  0xc9   : > { %v312_v36 = vadd.f32 %v311_v15, %v268_v11 }
  0xca   : > { %v352_v39 = vpop.f32.mrf.mxu2 }
  0xcb   : > { %727 = vmatmul.f32.gmra.mxu2 %v548_v50  ;;  %766 = vmatmul.f32.gmra.mxu3 %v556_v51  ;;  %v353_v40 = vadd.f32 %v352_v39, %v312_v36 }
  0xcd   : > { %v422_v18 = vpop.f32.mrf.mxu0  ;;  %v396_v43 = vadd.f32 %v395_v42, %v353_v40 }
  0xce   : > { %v423_v21 = vadd.f32 %v422_v18, %v378_v17 }
  0xd0   : > { %v457_v22 = vpop.f32.mrf.mxu1 }
  0xd1   : > { %v458_v25 = vadd.f32 %v457_v22, %v423_v21 }
  0xd3   : > { %731 = vmatmul.f32.gmra.mxu2 %v556_v51  ;;  %770 = vmatmul.f32.gmra.mxu3 %v564_v59  ;;  %473 = vst.msk [vmem:[%s1338_s27] sm:$0xff] %vm472_vm1, %v458_v25 }
  0xd4   : > { %481 = vrot.lane.b32.xlu2 %v458_v25, %s1177_s19 }
  0xd5   : > { %v426_v26 = vpop.f32.mrf.mxu0 }
  0xd6   : > { %v427_v27 = vadd.f32 %v426_v26, %v384_v24 }
  0xd8   : > { %v461_v28 = vpop.f32.mrf.mxu1 }
  0xd9   : > { %v462_v29 = vadd.f32 %v461_v28, %v427_v27 }
  0xdb   : > { %735 = vmatmul.f32.gmra.mxu2 %v564_v59  ;;  %474 = vst.msk [vmem:[%s1338_s27 + $0x8] sm:$0xff] %vm472_vm1, %v462_v29 }
  0xdc   : > { %483 = vrot.lane.b32.xlu2 %v462_v29, %s1177_s19 }
  0xdd   : > { %v430_v35 = vpop.f32.mrf.mxu0 }
  0xde   : > { %v431_v37 = vadd.f32 %v430_v35, %v390_v34 }
  0xe0   : > { %v465_v38 = vpop.f32.mrf.mxu1 }
  0xe1   : > { %v466_v41 = vadd.f32 %v465_v38, %v431_v37 }
  0xe3   : > { %485 = vrot.lane.b32.xlu0 %v466_v41, %s1177_s19  ;;  %475 = vst.msk [vmem:[%s1338_s27 + $0x10] sm:$0xff] %vm472_vm1, %v466_v41 }
  0xe5   : > { %v434_v44 = vpop.f32.mrf.mxu0 }
  0xe6   : > { %v435_v45 = vadd.f32 %v434_v44, %v396_v43 }
  0xe8   : > { %v469_v46 = vpop.f32.mrf.mxu1 }
  0xe9   : > { %v470_v47 = vadd.f32 %v469_v46, %v435_v45 }
  0xeb   : > { %487 = vrot.lane.b32.xlu1 %v470_v47, %s1177_s19  ;;  %476 = vst.msk [vmem:[%s1338_s27 + $0x18] sm:$0xff] %vm472_vm1, %v470_v47 }
 0x11a   : > { %v639_v55 = vpop.f32.mrf.mxu0 }
 0x11c   : > { %v679_v57 = vpop.f32.mrf.mxu1 }
 0x11e   : > { %v601_v48 = vpop.f32.mrf.mxu3 }
 0x122   : > { %v644_v62 = vpop.f32.mrf.mxu0 }
 0x124   : > { %v685_v3 = vpop.f32.mrf.mxu1 }
 0x126   : > { %v546_v49 = vpop.f32.mrf.mxu2  ;;  %v605_v50 = vpop.f32.mrf.mxu3 }
 0x127   : > { %v602_v56 = vadd.f32 %v601_v48, %v546_v49 }
 0x129   : > { %v640_v59 = vadd.f32 %v639_v55, %v602_v56 }
 0x12a   : > { %v649_v10 = vpop.f32.mrf.mxu0 }
 0x12b   : > { %v680_v0 = vadd.f32 %v679_v57, %v640_v59 }
 0x12c   : > { %v691_v15 = vpop.f32.mrf.mxu1 }
 0x12e   : > { %v554_v51 = vpop.f32.mrf.mxu2  ;;  %v609_v52 = vpop.f32.mrf.mxu3 }
 0x12f   : > { %v482_v61 = vpop.permute.xlu2 %481  ;;  %v606_v63 = vadd.f32 %v605_v50, %v554_v51 }
 0x130   : > { %927 = vst.msk [vmem:[%s1338_s27 + $0x20] sm:$0xff] %vm472_vm1, %v482_v61 }
 0x131   : > { %v645_v4 = vadd.f32 %v644_v62, %v606_v63 }
 0x132   : > { %v654_v21 = vpop.f32.mrf.mxu0 }
 0x133   : > { %v686_v9 = vadd.f32 %v685_v3, %v645_v4 }
 0x134   : > { %v697_v24 = vpop.f32.mrf.mxu1 }
 0x136   : > { %v562_v53 = vpop.f32.mrf.mxu2  ;;  %v613_v54 = vpop.f32.mrf.mxu3 }
 0x137   : > { %v484_v6 = vpop.permute.xlu2 %483  ;;  %v610_v8 = vadd.f32 %v609_v52, %v562_v53 }
 0x138   : > { %928 = vst.msk [vmem:[%s1338_s27 + $0x28] sm:$0xff] %vm472_vm1, %v484_v6 }
 0x139   : > { %v650_v13 = vadd.f32 %v649_v10, %v610_v8 }
 0x13b   : > { %v692_v17 = vadd.f32 %v691_v15, %v650_v13 }
 0x13e   : > { %v570_v58 = vpop.f32.mrf.mxu2  ;;  %v759_v60 = vpop.f32.mrf.mxu3 }
 0x13f   : > { %v614_v16 = vadd.f32 %v613_v54, %v570_v58 }
 0x141   : > { %v655_v22 = vadd.f32 %v654_v21, %v614_v16 }
 0x143   : > { %v698_v25 = vadd.f32 %v697_v24, %v655_v22 }
 0x146   : > { %v724_v1 = vpop.f32.mrf.mxu2  ;;  %v763_v7 = vpop.f32.mrf.mxu3 }
 0x147   : > { %v725_v2 = vadd.f32 %v724_v1, %v680_v0 }
 0x149   : > { %v760_v5 = vadd.f32 %v759_v60, %v725_v2 }
 0x14b   : > { %931 = vst.msk [vmem:[%s1338_s27 + $0x40] sm:$0xff] %vm472_vm1, %v760_v5  ;;  %783 = vrot.lane.b32.xlu2 %v760_v5, %s1177_s19 }
 0x14e   : > { %v728_v11 = vpop.f32.mrf.mxu2  ;;  %v767_v18 = vpop.f32.mrf.mxu3 }
 0x14f   : > { %v729_v12 = vadd.f32 %v728_v11, %v686_v9 }
 0x151   : > { %v764_v14 = vadd.f32 %v763_v7, %v729_v12 }
 0x153   : > { %932 = vst.msk [vmem:[%s1338_s27 + $0x48] sm:$0xff] %vm472_vm1, %v764_v14  ;;  %785 = vrot.lane.b32.xlu0 %v764_v14, %s1177_s19 }
 0x155   : > { %v486_v30 = vpop.permute.xlu0 %485 }
 0x156   : > { %v732_v19 = vpop.f32.mrf.mxu2  ;;  %v771_v28 = vpop.f32.mrf.mxu3  ;;  %929 = vst.msk [vmem:[%s1338_s27 + $0x30] sm:$0xff] %vm472_vm1, %v486_v30 }
 0x157   : > { %v733_v20 = vadd.f32 %v732_v19, %v692_v17 }
 0x159   : > { %v768_v23 = vadd.f32 %v767_v18, %v733_v20 }
 0x15b   : > { %933 = vst.msk [vmem:[%s1338_s27 + $0x50] sm:$0xff] %vm472_vm1, %v768_v23  ;;  %787 = vrot.lane.b32.xlu1 %v768_v23, %s1177_s19 }
 0x15d   : > { %v488_v31 = vpop.permute.xlu1 %487 }
 0x15e   : > { %v736_v26 = vpop.f32.mrf.mxu2  ;;  %930 = vst.msk [vmem:[%s1338_s27 + $0x38] sm:$0xff] %vm472_vm1, %v488_v31 }
 0x15f   : > { %v737_v27 = vadd.f32 %v736_v26, %v698_v25 }
 0x161   : > { %v772_v29 = vadd.f32 %v771_v28, %v737_v27 }
 0x163   : > { %934 = vst.msk [vmem:[%s1338_s27 + $0x58] sm:$0xff] %vm472_vm1, %v772_v29  ;;  %789 = vrot.lane.b32.xlu2 %v772_v29, %s1177_s19 }
 0x1a5   : > { %v784_v32 = vpop.permute.xlu2 %783 }
 0x1a6   : > { %935 = vst.msk [vmem:[%s1338_s27 + $0x60] sm:$0xff] %vm472_vm1, %v784_v32 }
 0x1bd   : > { %v790_v33 = vpop.permute.xlu2 %789 }
 0x1be   : > { %938 = vst.msk [vmem:[%s1338_s27 + $0x78] sm:$0xff] %vm472_vm1, %v790_v33 }
 0x1c5   : > { %v786_v34 = vpop.permute.xlu0 %785 }
 0x1c6   : > { %936 = vst.msk [vmem:[%s1338_s27 + $0x68] sm:$0xff] %vm472_vm1, %v786_v34 }
 0x1cd   : > { %v788_v35 = vpop.permute.xlu1 %787 }
 0x1ce   : > { %937 = vst.msk [vmem:[%s1338_s27 + $0x70] sm:$0xff] %vm472_vm1, %v788_v35 }
 0x1cf   : > { %1112 = shalt.err (!%p1109_p0)
}
 0x1d0   : > { %s1178_s30 = smov 128   ;;  %s1179_s24 = smov 8  }
 0x1d1   : > { %952 = dma.vmem_to_hbm [thread:$0]  (%p1277_p5), %s816_s21, 2048, %s818_s22, %s801_s23, %s1178_s30, %s1178_s30, %s1179_s24  }
 0x1d2 PF: > { %s832_s17 = sand.u32 1, %s1151_s9   ;;  %p963_p3 = pnand %p919_p11, %p1244_p6 }
 0x1d3   : > { %s833_s19 = scalar_lea.sflag [#allocation4], %s832_s17 }
 0x1d4   : > { %p964_p7 = pneg %p963_p3 }
 0x1d6   : > { %1146 = dma.done.wait (%p964_p7), %s833_s19, 2048  }
 0x1d7   : > { %1148 = vsyncadd (%p964_p7), %s833_s19, 4294965248  ;;  %s19_s14 = sadd.s32 1, %s1171_s14   ;;  %s1428_s9 = smov %s1155_s10 }
 0x1d8   : > { %p16_p9 = scmp.ge.s32.totalorder %s19_s14, 4   ;;  %s1429_s10 = smov %s1159_s11 }
 0x1d9   : > { %s1430_s11 = smov %s1286_s8  ;;  %s1431_s12 = smov %s1167_s13 }
 0x1da   : > { %s1432_s13 = smov %s1434_s29  ;;  %18 = sbr.rel (!%p16_p9) target bundleno = 7 (0x7), region = 80 }
 0x1df   :  { %839 = vsyncpa [#allocation3], 1 }
 0x1e0   :  { %841 = vsyncpa [#allocation3 + $0x1], 1 }
 0x1e1   :  { %842 = vsyncpa [#allocation6], 1 }
 0x1e2   :  { %843 = vsyncpa [#allocation4], 1 }
 0x1e3   :  { %845 = vsyncpa [#allocation4 + $0x1], 1 }

</bundles_post_ra>
